<compile_context>
chip_gen: v6e
topology: v6e:2x2x1
jax: 0.10.0
libtpu: 0.0.40
codegen_flags: <defaults>
</compile_context>

<pallas_src>
import functools

import jax
import jax.numpy as jnp
from jax.experimental import pallas as pl
from jax.experimental.pallas import tpu as pltpu


def _sign(x):
    # torch.sign semantics: sign(0) == 0.
    return jnp.where(x > 0, 1.0, jnp.where(x < 0, -1.0, 0.0)).astype(jnp.float32)


def _round_up(v, m):
    return (v + m - 1) // m * m


def _make_kernel(nblk, Cout, Ho, Wo, has_sc, prebuilt):
    HW = Ho * Wo

    def im2col_3x3(v, pix, col):
        """v: (C, Ho*Wo) flat image -> (9*C, Ho*Wo) stride-1 3x3 patch matrix.

        Tap (dh, dw) is a lane rotation of the flat image; lanes that wrapped
        across the image border are masked to zero (== the conv's zero pad).
        """
        zero = jnp.zeros_like(v)
        taps = []
        for dh in (-1, 0, 1):
            for dw in (-1, 0, 1):
                shift = dh * Wo + dw
                t = v if shift == 0 else pltpu.roll(v, (-shift) % HW, 1)
                conds = []
                if dh == -1:
                    conds.append(pix >= Wo)                 # row >= 1
                elif dh == 1:
                    conds.append(pix < (Ho - 1) * Wo)       # row <= Ho - 2
                if dw == -1:
                    conds.append(col >= 1)
                elif dw == 1:
                    conds.append(col <= Wo - 2)
                if conds:
                    ok = conds[0]
                    for c in conds[1:]:
                        ok = jnp.logical_and(ok, c)
                    t = jnp.where(ok, t, zero)
                taps.append(t)
        return jnp.concatenate(taps, axis=0)

    def kernel(*refs):
        if prebuilt:                 # stride != 1 (shortcut conv always present)
            p1_ref, xs_ref, w1_ref, w2_ref, wsc_ref, out_ref = refs
        elif has_sc:
            xs_ref, w1_ref, w2_ref, wsc_ref, out_ref = refs
        else:
            xs_ref, w1_ref, w2_ref, out_ref = refs

        w1 = w1_ref[...]                                   # (Cmid, 9*Cin_p) f32
        w2 = w2_ref[...]                                   # (Cout, 9*Cmid)  bf16
        wsc = wsc_ref[...] if has_sc else None             # (Cout, Cin_p)   f32

        # lane index -> output-pixel column; shared by all images / taps.
        pix = jax.lax.broadcasted_iota(jnp.int32, (1, HW), 1)
        col = pix % Wo

        for n in range(nblk):                              # nblk is small & static
            xs = xs_ref[n]                                 # (Cin_p, HW) f32
            if prebuilt:
                p1 = p1_ref[n]                             # (9*Cin_p, HW) f32
            else:
                p1 = im2col_3x3(xs, pix, col)

            # conv1: one fp32 MXU matmul (raw activations stay fp32).
            y1 = jnp.dot(w1, p1, preferred_element_type=jnp.float32)    # (Cmid, HW)

            # binary activation, then conv2: all operands are {-1,0,+1}, so the
            # bf16 matmul (with f32 accumulation) is bit-exact.
            a1 = _sign(y1)
            p2 = im2col_3x3(a1, pix, col).astype(jnp.bfloat16)          # (9*Cmid, HW)
            y2 = jnp.dot(w2, p2, preferred_element_type=jnp.float32)    # (Cout, HW)

            # shortcut
            if has_sc:
                ident = jnp.dot(wsc, xs, preferred_element_type=jnp.float32)
            else:
                ident = xs if xs.shape[0] == Cout else xs[:Cout, :]

            out_ref[n] = _sign(y2 + ident)

    return kernel


@functools.partial(jax.jit, static_argnames=("stride",))
def binary_residual_block(x_nchw, w1, w2, wsc=None, *, stride=1):
    """Pallas TPU implementation of BinaryResidualBlock.forward.

    x_nchw: (N, Cin, H, W) float32
    w1:     (Cout, Cin, 3, 3)   conv1 weight
    w2:     (Cout, Cout, 3, 3)  conv2 weight
    wsc:    (Cout, Cin, 1, 1)   shortcut 1x1 weight (required iff
            stride != 1 or Cin != Cout), else None.
    returns (N, Cout, Ho, Wo) float32
    """
    N, Cin, H, W = x_nchw.shape
    Cout = w1.shape[0]
    has_sc = (stride != 1) or (Cin != Cout)
    prebuilt = stride != 1
    Ho = (H + 2 - 3) // stride + 1
    Wo = (W + 2 - 3) // stride + 1
    HW = Ho * Wo

    # Pad channel dims to multiples of 8 so every in-kernel sublane concat and
    # matmul contraction is (8,128)-tile aligned.  Padded input channels are
    # zero and padded weight rows/cols are zero, so the math is unchanged
    # (and sign(0) == 0).
    Cin_p = _round_up(Cin, 8)
    Cmid = _round_up(Cout, 8)

    x = x_nchw.astype(jnp.float32)
    if Cin_p != Cin:
        x = jnp.pad(x, ((0, 0), (0, Cin_p - Cin), (0, 0), (0, 0)))

    # Binarize + lay out the grid-invariant weights ONCE, on the XLA side.
    # torch OIHW -> (Cout, kh, kw, Cin) -> (Cout, 9*Cin): column (kh*3+kw)*Cin+ci.
    w1b = jnp.sign(w1.astype(jnp.float32)).transpose(0, 2, 3, 1)       # (Cout,3,3,Cin)
    w1b = jnp.pad(w1b, ((0, Cmid - Cout), (0, 0), (0, 0), (0, Cin_p - Cin)))
    w1b = w1b.reshape(Cmid, 9 * Cin_p)

    w2b = jnp.sign(w2.astype(jnp.float32)).transpose(0, 2, 3, 1)       # (Cout,3,3,Cout)
    w2b = jnp.pad(w2b, ((0, 0), (0, 0), (0, 0), (0, Cmid - Cout)))
    w2b = w2b.reshape(Cout, 9 * Cmid).astype(jnp.bfloat16)

    if prebuilt:
        # stride != 1: build conv1's strided im2col patches and the strided
        # 1x1-shortcut input with cheap XLA slices (keeps strided sublane/lane
        # gathers out of the kernel).
        xpad = jnp.pad(x, ((0, 0), (0, 0), (1, 1), (1, 1)))
        taps = []
        for kh in range(3):
            for kw in range(3):
                t = jax.lax.slice(
                    xpad, (0, 0, kh, kw),
                    (N, Cin_p, kh + (Ho - 1) * stride + 1,
                     kw + (Wo - 1) * stride + 1),
                    (1, 1, stride, stride))
                taps.append(t.reshape(N, Cin_p, HW))
        p1 = jnp.concatenate(taps, axis=1)                     # (N, 9*Cin_p, HW)
        xs = x[:, :, ::stride, ::stride].reshape(N, Cin_p, HW)
    else:
        xs = x.reshape(N, Cin_p, HW)

    # Images per grid step: amortize per-step overhead, keep >= 2 grid steps
    # (v7x has 2 TensorCores) and stay well inside VMEM on every generation.
    bytes_per_img = 4 * HW * (10 * Cin_p + 20 * Cmid + 2 * Cout)
    nblk = 1
    for d in range(1, N + 1):
        if N % d != 0 or d > 16 or d * bytes_per_img > (8 << 20):
            continue
        if N // d >= 2 or N == 1:
            nblk = d

    data_inputs, data_specs = [], []
    if prebuilt:
        data_inputs.append(p1)
        data_specs.append(pl.BlockSpec((nblk, 9 * Cin_p, HW), lambda n: (n, 0, 0)))
    data_inputs.append(xs)
    data_specs.append(pl.BlockSpec((nblk, Cin_p, HW), lambda n: (n, 0, 0)))

    weight_inputs = [w1b, w2b]
    weight_specs = [
        pl.BlockSpec((Cmid, 9 * Cin_p), lambda n: (0, 0)),
        pl.BlockSpec((Cout, 9 * Cmid), lambda n: (0, 0)),
    ]
    if has_sc:
        wscb = jnp.sign(wsc[:, :, 0, 0].astype(jnp.float32))            # (Cout, Cin)
        wscb = jnp.pad(wscb, ((0, 0), (0, Cin_p - Cin)))
        weight_inputs.append(wscb)
        weight_specs.append(pl.BlockSpec((Cout, Cin_p), lambda n: (0, 0)))

    out_flat = pl.pallas_call(
        _make_kernel(nblk, Cout, Ho, Wo, has_sc, prebuilt),
        out_shape=jax.ShapeDtypeStruct((N, Cout, HW), jnp.float32),
        grid_spec=pltpu.PrefetchScalarGridSpec(
            num_scalar_prefetch=0,
            grid=(N // nblk,),
            in_specs=data_specs + weight_specs,
            out_specs=pl.BlockSpec((nblk, Cout, HW), lambda n: (n, 0, 0)),
        ),
        compiler_params=pltpu.CompilerParams(
            dimension_semantics=("parallel",),
            vmem_limit_bytes=32 * 1024 * 1024,
        ),
    )(*data_inputs, *weight_inputs)

    # Free metadata reshape back to NCHW spatial (kernel output is already NCHW).
    return out_flat.reshape(N, Cout, Ho, Wo)


# ---------------- pure-JAX reference (for correctness check) ----------------
def _reference(x, w1, w2, wsc, stride):
    dn = ("NCHW", "OIHW", "NCHW")

    def conv(a, w, s, pad):
        return jax.lax.conv_general_dilated(
            a, jnp.sign(w), (s, s), ((pad, pad), (pad, pad)), dimension_numbers=dn)

    identity = conv(x, wsc, stride, 0) if wsc is not None else x
    out = conv(x, w1, stride, 1)
    out = jnp.sign(out)
    out = conv(out, w2, 1, 1)
    return jnp.sign(out + identity)


if __name__ == "__main__":
    N, Cin, Cout, H, W, stride = 2, 4, 8, 16, 16, 1

    key = jax.random.PRNGKey(0)
    k1, k2, k3, k4 = jax.random.split(key, 4)
    x = jax.random.normal(k1, (N, Cin, H, W), jnp.float32)
    # Deterministic synthetic weights (shapes match nn.Conv2d in the module).
    w1 = jax.random.normal(k2, (Cout, Cin, 3, 3), jnp.float32) * 0.1
    w2 = jax.random.normal(k3, (Cout, Cout, 3, 3), jnp.float32) * 0.1
    wsc = jax.random.normal(k4, (Cout, Cin, 1, 1), jnp.float32) * 0.1  # Cin != Cout

    out = jax.block_until_ready(binary_residual_block(x, w1, w2, wsc, stride=stride))

    ref = _reference(x, w1, w2, wsc, stride)
    assert out.shape == ref.shape == (N, Cout, H // stride, W // stride)
    # Outputs are exactly {-1, 0, +1}; different fp32 accumulation orders can in
    # principle flip sign() of pre-activation values that are ~0, so tolerate a
    # vanishing mismatch fraction (a real bug would mismatch massively).
    mismatch = float(jnp.mean((jnp.abs(out - ref) > 1e-3).astype(jnp.float32)))
    if mismatch > 2e-3:
        raise AssertionError(
            f"Pallas kernel does not match reference (mismatch fraction {mismatch})")

    print("KERNEL_OK")
</pallas_src>

<mosaic_0001>
module attributes {stable_mosaic.version = 11 : i64} {
  func.func @kernel(%arg0: i32, %arg1: memref<1x8x256xf32, #tpu.memory_space<vmem>>, %arg2: memref<8x72xf32, #tpu.memory_space<vmem>>, %arg3: memref<8x72xbf16, #tpu.memory_space<vmem>>, %arg4: memref<8x8xf32, #tpu.memory_space<vmem>>, %arg5: memref<1x8x256xf32, #tpu.memory_space<vmem>>) attributes {dimension_semantics = [#tpu.dimension_semantics<parallel>], iteration_bounds = array<i64: 2>, scalar_prefetch = 0 : i64, scratch_operands = 0 : i64, tpu.core_type = #tpu.core_type<tc>, window_params = [{transform_indices = @transform_0, window_bounds = array<i64: 1, 8, 256>}, {pipeline_mode = #tpu.pipeline_mode<synchronous>, transform_indices = @transform_1, window_bounds = array<i64: 8, 72>}, {pipeline_mode = #tpu.pipeline_mode<synchronous>, transform_indices = @transform_2, window_bounds = array<i64: 8, 72>}, {pipeline_mode = #tpu.pipeline_mode<synchronous>, transform_indices = @transform_3, window_bounds = array<i64: 8, 8>}, {transform_indices = @transform_4, window_bounds = array<i64: 1, 8, 256>}]} {
    %c0 = arith.constant 0 : index
    %c0_0 = arith.constant 0 : index
    %0 = vector.load %arg2[%c0, %c0_0] : memref<8x72xf32, #tpu.memory_space<vmem>>, vector<8x72xf32>
    %c0_1 = arith.constant 0 : index
    %c0_2 = arith.constant 0 : index
    %1 = vector.load %arg3[%c0_1, %c0_2] : memref<8x72xbf16, #tpu.memory_space<vmem>>, vector<8x72xbf16>
    %c0_3 = arith.constant 0 : index
    %c0_4 = arith.constant 0 : index
    %2 = vector.load %arg4[%c0_3, %c0_4] : memref<8x8xf32, #tpu.memory_space<vmem>>, vector<8x8xf32>
    %3 = tpu.iota {dimensions = array<i32: 1>} : vector<1x256xi32>
    %c16_i32 = arith.constant 16 : i32
    %c0_i32 = arith.constant 0 : i32
    %4 = arith.cmpi eq, %c16_i32, %c0_i32 : i32
    %c1_i32 = arith.constant 1 : i32
    %5 = arith.select %4, %c1_i32, %c16_i32 : i32
    %6 = vector.broadcast %5 : i32 to vector<1x256xi32>
    %7 = arith.remsi %3, %6 : vector<1x256xi32>
    %c0_i32_5 = arith.constant 0 : i32
    %8 = vector.broadcast %c0_i32_5 : i32 to vector<1x256xi32>
    %9 = arith.cmpi ne, %7, %8 : vector<1x256xi32>
    %c0_i32_6 = arith.constant 0 : i32
    %10 = vector.broadcast %c0_i32_6 : i32 to vector<1x256xi32>
    %11 = arith.cmpi slt, %7, %10 : vector<1x256xi32>
    %c0_i32_7 = arith.constant 0 : i32
    %12 = arith.cmpi slt, %5, %c0_i32_7 : i32
    %13 = vector.broadcast %12 : i1 to vector<1x256xi1>
    %14 = vector.broadcast %13 : vector<1x256xi1> to vector<1x256xi1>
    %15 = arith.xori %11, %14 : vector<1x256xi1>
    %16 = arith.andi %15, %9 : vector<1x256xi1>
    %17 = vector.broadcast %5 : i32 to vector<1x256xi32>
    %18 = arith.addi %7, %17 : vector<1x256xi32>
    %19 = arith.select %16, %18, %7 : vector<1x256xi1>, vector<1x256xi32>
    %c0_8 = arith.constant 0 : index
    %c0_9 = arith.constant 0 : index
    %c0_10 = arith.constant 0 : index
    %20 = vector.load %arg1[%c0_8, %c0_9, %c0_10] : memref<1x8x256xf32, #tpu.memory_space<vmem>>, vector<1x8x256xf32>
    %21 = vector.shape_cast %20 : vector<1x8x256xf32> to vector<8x256xf32>
    %cst = arith.constant 0.000000e+00 : f32
    %22 = vector.broadcast %cst : f32 to vector<8x256xf32>
    %c17_i32 = arith.constant 17 : i32
    %23 = tpu.dynamic_rotate %21 by %c17_i32 dim 1 : vector<8x256xf32>, i32 -> vector<8x256xf32>
    %c16_i32_11 = arith.constant 16 : i32
    %24 = vector.broadcast %c16_i32_11 : i32 to vector<1x256xi32>
    %25 = arith.cmpi sge, %3, %24 : vector<1x256xi32>
    %c1_i32_12 = arith.constant 1 : i32
    %26 = vector.broadcast %c1_i32_12 : i32 to vector<1x256xi32>
    %27 = arith.cmpi sge, %19, %26 : vector<1x256xi32>
    %28 = arith.andi %25, %27 : vector<1x256xi1>
    %29 = vector.shape_cast %28 : vector<1x256xi1> to vector<1x256xi1>
    %30 = vector.broadcast %29 : vector<1x256xi1> to vector<8x256xi1>
    %31 = arith.select %30, %23, %22 : vector<8x256xi1>, vector<8x256xf32>
    %c16_i32_13 = arith.constant 16 : i32
    %32 = tpu.dynamic_rotate %21 by %c16_i32_13 dim 1 : vector<8x256xf32>, i32 -> vector<8x256xf32>
    %c16_i32_14 = arith.constant 16 : i32
    %33 = vector.broadcast %c16_i32_14 : i32 to vector<1x256xi32>
    %34 = arith.cmpi sge, %3, %33 : vector<1x256xi32>
    %35 = vector.shape_cast %34 : vector<1x256xi1> to vector<1x256xi1>
    %36 = vector.broadcast %35 : vector<1x256xi1> to vector<8x256xi1>
    %37 = arith.select %36, %32, %22 : vector<8x256xi1>, vector<8x256xf32>
    %c15_i32 = arith.constant 15 : i32
    %38 = tpu.dynamic_rotate %21 by %c15_i32 dim 1 : vector<8x256xf32>, i32 -> vector<8x256xf32>
    %c16_i32_15 = arith.constant 16 : i32
    %39 = vector.broadcast %c16_i32_15 : i32 to vector<1x256xi32>
    %40 = arith.cmpi sge, %3, %39 : vector<1x256xi32>
    %c14_i32 = arith.constant 14 : i32
    %41 = vector.broadcast %c14_i32 : i32 to vector<1x256xi32>
    %42 = arith.cmpi sle, %19, %41 : vector<1x256xi32>
    %43 = arith.andi %40, %42 : vector<1x256xi1>
    %44 = vector.shape_cast %43 : vector<1x256xi1> to vector<1x256xi1>
    %45 = vector.broadcast %44 : vector<1x256xi1> to vector<8x256xi1>
    %46 = arith.select %45, %38, %22 : vector<8x256xi1>, vector<8x256xf32>
    %c1_i32_16 = arith.constant 1 : i32
    %47 = tpu.dynamic_rotate %21 by %c1_i32_16 dim 1 : vector<8x256xf32>, i32 -> vector<8x256xf32>
    %c1_i32_17 = arith.constant 1 : i32
    %48 = vector.broadcast %c1_i32_17 : i32 to vector<1x256xi32>
    %49 = arith.cmpi sge, %19, %48 : vector<1x256xi32>
    %50 = vector.shape_cast %49 : vector<1x256xi1> to vector<1x256xi1>
    %51 = vector.broadcast %50 : vector<1x256xi1> to vector<8x256xi1>
    %52 = arith.select %51, %47, %22 : vector<8x256xi1>, vector<8x256xf32>
    %c255_i32 = arith.constant 255 : i32
    %53 = tpu.dynamic_rotate %21 by %c255_i32 dim 1 : vector<8x256xf32>, i32 -> vector<8x256xf32>
    %c14_i32_18 = arith.constant 14 : i32
    %54 = vector.broadcast %c14_i32_18 : i32 to vector<1x256xi32>
    %55 = arith.cmpi sle, %19, %54 : vector<1x256xi32>
    %56 = vector.shape_cast %55 : vector<1x256xi1> to vector<1x256xi1>
    %57 = vector.broadcast %56 : vector<1x256xi1> to vector<8x256xi1>
    %58 = arith.select %57, %53, %22 : vector<8x256xi1>, vector<8x256xf32>
    %c241_i32 = arith.constant 241 : i32
    %59 = tpu.dynamic_rotate %21 by %c241_i32 dim 1 : vector<8x256xf32>, i32 -> vector<8x256xf32>
    %c240_i32 = arith.constant 240 : i32
    %60 = vector.broadcast %c240_i32 : i32 to vector<1x256xi32>
    %61 = arith.cmpi slt, %3, %60 : vector<1x256xi32>
    %c1_i32_19 = arith.constant 1 : i32
    %62 = vector.broadcast %c1_i32_19 : i32 to vector<1x256xi32>
    %63 = arith.cmpi sge, %19, %62 : vector<1x256xi32>
    %64 = arith.andi %61, %63 : vector<1x256xi1>
    %65 = vector.shape_cast %64 : vector<1x256xi1> to vector<1x256xi1>
    %66 = vector.broadcast %65 : vector<1x256xi1> to vector<8x256xi1>
    %67 = arith.select %66, %59, %22 : vector<8x256xi1>, vector<8x256xf32>
    %c240_i32_20 = arith.constant 240 : i32
    %68 = tpu.dynamic_rotate %21 by %c240_i32_20 dim 1 : vector<8x256xf32>, i32 -> vector<8x256xf32>
    %c240_i32_21 = arith.constant 240 : i32
    %69 = vector.broadcast %c240_i32_21 : i32 to vector<1x256xi32>
    %70 = arith.cmpi slt, %3, %69 : vector<1x256xi32>
    %71 = vector.shape_cast %70 : vector<1x256xi1> to vector<1x256xi1>
    %72 = vector.broadcast %71 : vector<1x256xi1> to vector<8x256xi1>
    %73 = arith.select %72, %68, %22 : vector<8x256xi1>, vector<8x256xf32>
    %c239_i32 = arith.constant 239 : i32
    %74 = tpu.dynamic_rotate %21 by %c239_i32 dim 1 : vector<8x256xf32>, i32 -> vector<8x256xf32>
    %c240_i32_22 = arith.constant 240 : i32
    %75 = vector.broadcast %c240_i32_22 : i32 to vector<1x256xi32>
    %76 = arith.cmpi slt, %3, %75 : vector<1x256xi32>
    %c14_i32_23 = arith.constant 14 : i32
    %77 = vector.broadcast %c14_i32_23 : i32 to vector<1x256xi32>
    %78 = arith.cmpi sle, %19, %77 : vector<1x256xi32>
    %79 = arith.andi %76, %78 : vector<1x256xi1>
    %80 = vector.shape_cast %79 : vector<1x256xi1> to vector<1x256xi1>
    %81 = vector.broadcast %80 : vector<1x256xi1> to vector<8x256xi1>
    %82 = arith.select %81, %74, %22 : vector<8x256xi1>, vector<8x256xf32>
    %83 = tpu.concatenate %31, %37, %46, %52, %21, %58, %67, %73, %82 in 0 : vector<8x256xf32>, vector<8x256xf32>, vector<8x256xf32>, vector<8x256xf32>, vector<8x256xf32>, vector<8x256xf32>, vector<8x256xf32>, vector<8x256xf32>, vector<8x256xf32> -> vector<72x256xf32>
    %cst_24 = arith.constant dense<0.000000e+00> : vector<8x256xf32>
    %84 = tpu.matmul %0, %83, %cst_24 {dimension_numbers = #tpu.dot_dimension_numbers<[1], [0], [0], [1], [0, 0, 1, 1], [], []>} : vector<8x72xf32>, vector<72x256xf32>, vector<8x256xf32> -> vector<8x256xf32>
    %cst_25 = arith.constant 0.000000e+00 : f32
    %85 = vector.broadcast %cst_25 : f32 to vector<8x256xf32>
    %86 = arith.cmpf ogt, %84, %85 : vector<8x256xf32>
    %cst_26 = arith.constant 0.000000e+00 : f32
    %87 = vector.broadcast %cst_26 : f32 to vector<8x256xf32>
    %88 = arith.cmpf olt, %84, %87 : vector<8x256xf32>
    %cst_27 = arith.constant -1.000000e+00 : f32
    %cst_28 = arith.constant 0.000000e+00 : f32
    %89 = vector.broadcast %cst_27 : f32 to vector<8x256xf32>
    %90 = vector.broadcast %cst_28 : f32 to vector<8x256xf32>
    %91 = arith.select %88, %89, %90 : vector<8x256xi1>, vector<8x256xf32>
    %cst_29 = arith.constant 1.000000e+00 : f32
    %92 = vector.broadcast %cst_29 : f32 to vector<8x256xf32>
    %93 = arith.select %86, %92, %91 : vector<8x256xi1>, vector<8x256xf32>
    %cst_30 = arith.constant 0.000000e+00 : f32
    %94 = vector.broadcast %cst_30 : f32 to vector<8x256xf32>
    %c17_i32_31 = arith.constant 17 : i32
    %95 = tpu.dynamic_rotate %93 by %c17_i32_31 dim 1 : vector<8x256xf32>, i32 -> vector<8x256xf32>
    %c16_i32_32 = arith.constant 16 : i32
    %96 = vector.broadcast %c16_i32_32 : i32 to vector<1x256xi32>
    %97 = arith.cmpi sge, %3, %96 : vector<1x256xi32>
    %c1_i32_33 = arith.constant 1 : i32
    %98 = vector.broadcast %c1_i32_33 : i32 to vector<1x256xi32>
    %99 = arith.cmpi sge, %19, %98 : vector<1x256xi32>
    %100 = arith.andi %97, %99 : vector<1x256xi1>
    %101 = vector.shape_cast %100 : vector<1x256xi1> to vector<1x256xi1>
    %102 = vector.broadcast %101 : vector<1x256xi1> to vector<8x256xi1>
    %103 = arith.select %102, %95, %94 : vector<8x256xi1>, vector<8x256xf32>
    %c16_i32_34 = arith.constant 16 : i32
    %104 = tpu.dynamic_rotate %93 by %c16_i32_34 dim 1 : vector<8x256xf32>, i32 -> vector<8x256xf32>
    %c16_i32_35 = arith.constant 16 : i32
    %105 = vector.broadcast %c16_i32_35 : i32 to vector<1x256xi32>
    %106 = arith.cmpi sge, %3, %105 : vector<1x256xi32>
    %107 = vector.shape_cast %106 : vector<1x256xi1> to vector<1x256xi1>
    %108 = vector.broadcast %107 : vector<1x256xi1> to vector<8x256xi1>
    %109 = arith.select %108, %104, %94 : vector<8x256xi1>, vector<8x256xf32>
    %c15_i32_36 = arith.constant 15 : i32
    %110 = tpu.dynamic_rotate %93 by %c15_i32_36 dim 1 : vector<8x256xf32>, i32 -> vector<8x256xf32>
    %c16_i32_37 = arith.constant 16 : i32
    %111 = vector.broadcast %c16_i32_37 : i32 to vector<1x256xi32>
    %112 = arith.cmpi sge, %3, %111 : vector<1x256xi32>
    %c14_i32_38 = arith.constant 14 : i32
    %113 = vector.broadcast %c14_i32_38 : i32 to vector<1x256xi32>
    %114 = arith.cmpi sle, %19, %113 : vector<1x256xi32>
    %115 = arith.andi %112, %114 : vector<1x256xi1>
    %116 = vector.shape_cast %115 : vector<1x256xi1> to vector<1x256xi1>
    %117 = vector.broadcast %116 : vector<1x256xi1> to vector<8x256xi1>
    %118 = arith.select %117, %110, %94 : vector<8x256xi1>, vector<8x256xf32>
    %c1_i32_39 = arith.constant 1 : i32
    %119 = tpu.dynamic_rotate %93 by %c1_i32_39 dim 1 : vector<8x256xf32>, i32 -> vector<8x256xf32>
    %c1_i32_40 = arith.constant 1 : i32
    %120 = vector.broadcast %c1_i32_40 : i32 to vector<1x256xi32>
    %121 = arith.cmpi sge, %19, %120 : vector<1x256xi32>
    %122 = vector.shape_cast %121 : vector<1x256xi1> to vector<1x256xi1>
    %123 = vector.broadcast %122 : vector<1x256xi1> to vector<8x256xi1>
    %124 = arith.select %123, %119, %94 : vector<8x256xi1>, vector<8x256xf32>
    %c255_i32_41 = arith.constant 255 : i32
    %125 = tpu.dynamic_rotate %93 by %c255_i32_41 dim 1 : vector<8x256xf32>, i32 -> vector<8x256xf32>
    %c14_i32_42 = arith.constant 14 : i32
    %126 = vector.broadcast %c14_i32_42 : i32 to vector<1x256xi32>
    %127 = arith.cmpi sle, %19, %126 : vector<1x256xi32>
    %128 = vector.shape_cast %127 : vector<1x256xi1> to vector<1x256xi1>
    %129 = vector.broadcast %128 : vector<1x256xi1> to vector<8x256xi1>
    %130 = arith.select %129, %125, %94 : vector<8x256xi1>, vector<8x256xf32>
    %c241_i32_43 = arith.constant 241 : i32
    %131 = tpu.dynamic_rotate %93 by %c241_i32_43 dim 1 : vector<8x256xf32>, i32 -> vector<8x256xf32>
    %c240_i32_44 = arith.constant 240 : i32
    %132 = vector.broadcast %c240_i32_44 : i32 to vector<1x256xi32>
    %133 = arith.cmpi slt, %3, %132 : vector<1x256xi32>
    %c1_i32_45 = arith.constant 1 : i32
    %134 = vector.broadcast %c1_i32_45 : i32 to vector<1x256xi32>
    %135 = arith.cmpi sge, %19, %134 : vector<1x256xi32>
    %136 = arith.andi %133, %135 : vector<1x256xi1>
    %137 = vector.shape_cast %136 : vector<1x256xi1> to vector<1x256xi1>
    %138 = vector.broadcast %137 : vector<1x256xi1> to vector<8x256xi1>
    %139 = arith.select %138, %131, %94 : vector<8x256xi1>, vector<8x256xf32>
    %c240_i32_46 = arith.constant 240 : i32
    %140 = tpu.dynamic_rotate %93 by %c240_i32_46 dim 1 : vector<8x256xf32>, i32 -> vector<8x256xf32>
    %c240_i32_47 = arith.constant 240 : i32
    %141 = vector.broadcast %c240_i32_47 : i32 to vector<1x256xi32>
    %142 = arith.cmpi slt, %3, %141 : vector<1x256xi32>
    %143 = vector.shape_cast %142 : vector<1x256xi1> to vector<1x256xi1>
    %144 = vector.broadcast %143 : vector<1x256xi1> to vector<8x256xi1>
    %145 = arith.select %144, %140, %94 : vector<8x256xi1>, vector<8x256xf32>
    %c239_i32_48 = arith.constant 239 : i32
    %146 = tpu.dynamic_rotate %93 by %c239_i32_48 dim 1 : vector<8x256xf32>, i32 -> vector<8x256xf32>
    %c240_i32_49 = arith.constant 240 : i32
    %147 = vector.broadcast %c240_i32_49 : i32 to vector<1x256xi32>
    %148 = arith.cmpi slt, %3, %147 : vector<1x256xi32>
    %c14_i32_50 = arith.constant 14 : i32
    %149 = vector.broadcast %c14_i32_50 : i32 to vector<1x256xi32>
    %150 = arith.cmpi sle, %19, %149 : vector<1x256xi32>
    %151 = arith.andi %148, %150 : vector<1x256xi1>
    %152 = vector.shape_cast %151 : vector<1x256xi1> to vector<1x256xi1>
    %153 = vector.broadcast %152 : vector<1x256xi1> to vector<8x256xi1>
    %154 = arith.select %153, %146, %94 : vector<8x256xi1>, vector<8x256xf32>
    %155 = tpu.concatenate %103, %109, %118, %124, %93, %130, %139, %145, %154 in 0 : vector<8x256xf32>, vector<8x256xf32>, vector<8x256xf32>, vector<8x256xf32>, vector<8x256xf32>, vector<8x256xf32>, vector<8x256xf32>, vector<8x256xf32>, vector<8x256xf32> -> vector<72x256xf32>
    %156 = arith.truncf %155 : vector<72x256xf32> to vector<72x256xbf16>
    %cst_51 = arith.constant dense<0.000000e+00> : vector<8x256xf32>
    %157 = tpu.matmul %1, %156, %cst_51 {dimension_numbers = #tpu.dot_dimension_numbers<[1], [0], [0], [1], [0, 0, 1, 1], [], []>} : vector<8x72xbf16>, vector<72x256xbf16>, vector<8x256xf32> -> vector<8x256xf32>
    %cst_52 = arith.constant dense<0.000000e+00> : vector<8x256xf32>
    %158 = tpu.matmul %2, %21, %cst_52 {dimension_numbers = #tpu.dot_dimension_numbers<[1], [0], [0], [1], [0, 0, 1, 1], [], []>} : vector<8x8xf32>, vector<8x256xf32>, vector<8x256xf32> -> vector<8x256xf32>
    %159 = arith.addf %157, %158 : vector<8x256xf32>
    %cst_53 = arith.constant 0.000000e+00 : f32
    %160 = vector.broadcast %cst_53 : f32 to vector<8x256xf32>
    %161 = arith.cmpf ogt, %159, %160 : vector<8x256xf32>
    %cst_54 = arith.constant 0.000000e+00 : f32
    %162 = vector.broadcast %cst_54 : f32 to vector<8x256xf32>
    %163 = arith.cmpf olt, %159, %162 : vector<8x256xf32>
    %cst_55 = arith.constant -1.000000e+00 : f32
    %cst_56 = arith.constant 0.000000e+00 : f32
    %164 = vector.broadcast %cst_55 : f32 to vector<8x256xf32>
    %165 = vector.broadcast %cst_56 : f32 to vector<8x256xf32>
    %166 = arith.select %163, %164, %165 : vector<8x256xi1>, vector<8x256xf32>
    %cst_57 = arith.constant 1.000000e+00 : f32
    %167 = vector.broadcast %cst_57 : f32 to vector<8x256xf32>
    %168 = arith.select %161, %167, %166 : vector<8x256xi1>, vector<8x256xf32>
    %c0_58 = arith.constant 0 : index
    %c0_59 = arith.constant 0 : index
    %c0_60 = arith.constant 0 : index
    %169 = vector.load %arg5[%c0_58, %c0_59, %c0_60] : memref<1x8x256xf32, #tpu.memory_space<vmem>>, vector<1x8x256xf32>
    %170 = vector.shape_cast %169 : vector<1x8x256xf32> to vector<8x256xf32>
    %171 = vector.shape_cast %168 : vector<8x256xf32> to vector<1x8x256xf32>
    tpu.vector_store %arg5[%c0_58, %c0_59, %c0_60], %171 {strides = array<i32>} : memref<1x8x256xf32, #tpu.memory_space<vmem>>, vector<1x8x256xf32>,
    return
  }
  func.func @transform_0(%arg0: i32) -> (i32, i32, i32) {
    %c0_i32 = arith.constant 0 : i32
    %c0_i32_0 = arith.constant 0 : i32
    %c0_i32_1 = arith.constant 0 : i32
    return %arg0, %c0_i32, %c0_i32_0 : i32, i32, i32
  }
  func.func @transform_1(%arg0: i32) -> (i32, i32) {
    %c0_i32 = arith.constant 0 : i32
    %c0_i32_0 = arith.constant 0 : i32
    %c0_i32_1 = arith.constant 0 : i32
    return %c0_i32, %c0_i32_0 : i32, i32
  }
  func.func @transform_2(%arg0: i32) -> (i32, i32) {
    %c0_i32 = arith.constant 0 : i32
    %c0_i32_0 = arith.constant 0 : i32
    %c0_i32_1 = arith.constant 0 : i32
    return %c0_i32, %c0_i32_0 : i32, i32
  }
  func.func @transform_3(%arg0: i32) -> (i32, i32) {
    %c0_i32 = arith.constant 0 : i32
    %c0_i32_0 = arith.constant 0 : i32
    %c0_i32_1 = arith.constant 0 : i32
    return %c0_i32, %c0_i32_0 : i32, i32
  }
  func.func @transform_4(%arg0: i32) -> (i32, i32, i32) {
    %c0_i32 = arith.constant 0 : i32
    %c0_i32_0 = arith.constant 0 : i32
    %c0_i32_1 = arith.constant 0 : i32
    return %arg0, %c0_i32, %c0_i32_0 : i32, i32, i32
  }
}

</mosaic_0001>

<bundles_post_ra>
// kernel: binary_residual_block.1
= control target key start
LH: loop header
LB: loop body
LE: loop exit
PB: predicated region body
PF: predicated region fallthrough
CT: control target
= control target key end

     0   :  { %s857_s15 = smov 0   ;;  %s1145_s0 = inlined_call_operand.vmem [shape: f32[2,8,256], index: 0, kind: input, shape index: {}]   ;;  %s1146_s1 = inlined_call_operand.vmem [shape: f32[8,72], index: 1, kind: input, shape index: {}]   ;;  %s1147_s2 = inlined_call_operand.vmem [shape: bf16[8,72], index: 2, kind: input, shape index: {}]   ;;  %s1148_s3 = inlined_call_operand.vmem [shape: f32[8,8], index: 3, kind: input, shape index: {}]   ;;  %s1149_s4 = inlined_call_operand.vmem [shape: f32[2,8,256], index: 4, kind: output, shape index: {}]  }
   0x1 LB: > { %s699_s16 = sadd.s32 4294967295, %s819_s15   ;;  %p703_p0 = scmp.ge.s32.totalorder %s819_s15, 1  ;;  %s819_s15 = sphi %s857_s15, %s14_s15  }
   0x2   : > { %p162_p1 = scmp.lt.s32.totalorder %s819_s15, 3 }
   0x4   : > { %p163_p2 = pnand %p703_p0, %p162_p1 }
   0x5   : > { %p188_p3 = scmp.lt.s32.totalorder (!%p163_p2), %s699_s16, 1  ;;  %s821_s21 = smov (!%p163_p2), 112  }
   0x6   : > { %166 = sbr.rel (%p163_p2) target bundleno = 703 (0x2bf), region = 36  ;;  %s822_s22 = smov (!%p163_p2), 111  }
   0x7   : > { %s823_s23 = smov (!%p163_p2), 113   ;;  %s824_s24 = smov (!%p163_p2), 127  }
   0x8   : > { %s825_s25 = smov (!%p163_p2), 1   ;;  %s827_s26 = smov (!%p163_p2), 15  }
   0x9   : > { %s828_s27 = smov (!%p163_p2), 16   ;;  %s829_s28 = smov (!%p163_p2), 17  }
   0xb   : > { %s1186_s16 = smov (!%p188_p3, %s699_s16), 1  ;;  %v826_v2 = vmov 0.0   ;;  %v202_v3 = vlaneseq  ;;  %v199_v48 = vld [vmem:[%s1146_s1] sm:$0xff]  ;;  %v830_v57 = vmov 0  }
   0xc   : > { %s752_s17 = sshll.u32 %s1186_s16, 4  ;;  %419 = vmatprep.mubr.f32.mxu0 %v826_v2  ;;  %v201_v56 = vld [vmem:[%s1148_s3] sm:$0xff]  ;;  %625 = vmatprep.mubr.bf16.mxu1 %v830_v57 }
   0xd   : > { %s192_s20 = scalar_lea.vmem %s1145_s0, %s752_s17  ;;  %v910_v4 = vand.u32 127, %v202_v3  ;;  %v200_v15 = vld [vmem:[%s1147_s2] sm:$0xf]  ;;  %s197_s11 = scalar_lea.vmem %s1149_s4, %s752_s17 }
   0xe   : > { %v873_v0 = vld [vmem:[%s192_s20] sm:$0xff]  ;;  %v879_v1 = vld [vmem:[%s192_s20 + $0x8] sm:$0xff] }
   0xf   : > { %323 = vrot.lane.b32.xlu1 %v873_v0, %s821_s21  ;;  %336 = vrot.lane.b32.xlu0 %v873_v0, %s822_s22  ;;  %v913_v5 = vadd.s32 128, %v910_v4  ;;  %v209_v10 = vand.u32 15, %v910_v4  ;;  %vm340_vm2 = vcmp.lt.s32.totalorder %v910_v4, 111  ;;  %vm327_vm4 = vcmp.lt.s32.totalorder %v910_v4, 112 }
  0x10   : > { %vm310_vm7 = vcmp.lt.s32.totalorder %v910_v4, 113  ;;  %vm1155_vm10 = vcmp.lt.s32.totalorder %v910_v4, 127  ;;  %vm1150_vm11 = vcmp.lt.s32.totalorder %v910_v4, 1  ;;  %vm1153_vm12 = vcmp.ge.s32.totalorder %v910_v4, 16 }
  0x11   : > { %v216_v6 = vand.u32 15, %v913_v5  ;;  %vm1156_vm1 = vcmp.lt.s32.totalorder %v913_v5, 240  ;;  %vm932_vm5 = vcmp.le.s32.totalorder %v209_v10, 14  ;;  %vm963_vm9 = vcmp.ge.s32.totalorder %v209_v10, 1 }
  0x12   : > { %vm1151_vm13 = vcmp.lt.s32.totalorder %v910_v4, 15  ;;  %vm1001_vm14 = vmand %vm1153_vm12, %vm932_vm5  ;;  %vm1152_vm15 = vcmp.lt.s32.totalorder %v910_v4, 16 }
  0x13   : > { %325 = vrot.lane.b32.xlu1 %v879_v1, %s821_s21  ;;  %338 = vrot.lane.b32.xlu0 %v879_v1, %s822_s22  ;;  %vm916_vm0 = vcmp.le.s32.totalorder %v216_v6, 14  ;;  %vm936_vm6 = vcmp.ge.s32.totalorder %v216_v6, 1 }
  0x14   : > { %vm927_vm3 = vmand %vm1156_vm1, %vm916_vm0 }
  0x15   : > { %vm955_vm8 = vmand %vm1156_vm1, %vm936_vm6 }
  0x17   : > { %308 = vrot.lane.b32.xlu1 %v879_v1, %s823_s23  ;;  %306 = vrot.lane.b32.xlu0 %v873_v0, %s823_s23 }
  0x1b   : > { %295 = vrot.lane.b32.xlu1 %v879_v1, %s824_s24  ;;  %293 = vrot.lane.b32.xlu0 %v873_v0, %s824_s24 }
  0x1f   : > { %282 = vrot.lane.b32.xlu1 %v879_v1, %s825_s25  ;;  %280 = vrot.lane.b32.xlu0 %v873_v0, %s825_s25 }
  0x23   : > { %265 = vrot.lane.b32.xlu1 %v879_v1, %s827_s26  ;;  %263 = vrot.lane.b32.xlu0 %v873_v0, %s827_s26 }
  0x27   : > { %252 = vrot.lane.b32.xlu1 %v879_v1, %s828_s27  ;;  %250 = vrot.lane.b32.xlu0 %v873_v0, %s828_s27 }
  0x2b   : > { %233 = vrot.lane.b32.xlu1 %v879_v1, %s829_s28  ;;  %231 = vrot.lane.b32.xlu0 %v873_v0, %s829_s28 }
  0x81   : > { %v324_v7 = vpop.permute.xlu1 %323  ;;  %v337_v8 = vpop.permute.xlu0 %336 }
  0x85   : > { %v326_v12 = vpop.permute.xlu1 %325  ;;  %v339_v13 = vpop.permute.xlu0 %338 }
  0x86   : > { %v342_v16 = vsel %vm340_vm2, %v339_v13, %v337_v8  ;;  %v341_v17 = vsel %vm340_vm2, %v337_v8, %v339_v13  ;;  %v329_v18 = vsel %vm327_vm4, %v326_v12, %v324_v7  ;;  %v328_v22 = vsel %vm327_vm4, %v324_v7, %v326_v12 }
  0x87   : > { %708 = vmatprep.subr.msk.mxu0 %vm927_vm3, %v342_v16 }
  0x88   : > { %709 = vmatpush1.msk.msra.mxu0 %vm932_vm5, %v341_v17 }
  0x89   : > { %v309_v20 = vpop.permute.xlu1 %308  ;;  %710 = vmatprep.subr.msk.mxu0 %vm1156_vm1, %v329_v18  ;;  %v307_v21 = vpop.permute.xlu0 %306 }
  0x8a   : > { %v311_v24 = vsel %vm310_vm7, %v307_v21, %v309_v20  ;;  %v312_v25 = vsel %vm310_vm7, %v309_v20, %v307_v21  ;;  %372 = vmatpush1.msra.mxu0 %v328_v22 }
  0x8b   : > { %711 = vmatprep.subr.msk.mxu0 %vm955_vm8, %v312_v25 }
  0x8c   : > { %712 = vmatpush1.msk.msra.mxu0 %vm963_vm9, %v311_v24 }
  0x8d   : > { %v296_v26 = vpop.permute.xlu1 %295  ;;  %v294_v27 = vpop.permute.xlu0 %293 }
  0x8e   : > { %v298_v28 = vsel %vm1155_vm10, %v294_v27, %v296_v26  ;;  %v299_v29 = vsel %vm1155_vm10, %v296_v26, %v294_v27 }
  0x8f   : > { %713 = vmatprep.subr.msk.mxu0 %vm916_vm0, %v299_v29 }
  0x90   : > { %714 = vmatpush1.msk.msra.mxu0 %vm932_vm5, %v298_v28 }
  0x91   : > { %v283_v30 = vpop.permute.xlu1 %282  ;;  %377 = vmatprep.subr.mxu0 %v879_v1  ;;  %v281_v31 = vpop.permute.xlu0 %280 }
  0x92   : > { %v285_v32 = vsel %vm1150_vm11, %v281_v31, %v283_v30  ;;  %v286_v33 = vsel %vm1150_vm11, %v283_v30, %v281_v31  ;;  %378 = vmatpush1.msra.mxu0 %v873_v0  ;;  %vm1154_vm11 = vcmp.lt.s32.totalorder %v910_v4, 17 }
  0x93   : > { %715 = vmatprep.subr.msk.mxu0 %vm936_vm6, %v285_v32 }
  0x94   : > { %716 = vmatpush1.msk.msra.mxu0 %vm963_vm9, %v286_v33 }
  0x95   : > { %v266_v34 = vpop.permute.xlu1 %265  ;;  %v264_v35 = vpop.permute.xlu0 %263 }
  0x96   : > { %v268_v37 = vsel %vm1151_vm13, %v264_v35, %v266_v34  ;;  %v269_v38 = vsel %vm1151_vm13, %v266_v34, %v264_v35  ;;  %vm1025_vm13 = vmand %vm1153_vm12, %vm963_vm9 }
  0x97   : > { %717 = vmatprep.subr.msk.mxu0 %vm916_vm0, %v268_v37 }
  0x98   : > { %718 = vmatpush1.msk.msra.mxu0 %vm1001_vm14, %v269_v38 }
  0x99   : > { %v253_v39 = vpop.permute.xlu1 %252  ;;  %v251_v40 = vpop.permute.xlu0 %250 }
  0x9a   : > { %v256_v41 = vsel %vm1152_vm15, %v253_v39, %v251_v40  ;;  %v255_v42 = vsel %vm1152_vm15, %v251_v40, %v253_v39  ;;  %vm351_vm15 = vcmask 588800  }
  0x9b   : > { %383 = vmatprep.subr.mxu0 %v255_v42 }
  0x9c   : > { %719 = vmatpush1.msk.msra.mxu0 %vm1153_vm12, %v256_v41 }
  0x9d   : > { %v234_v43 = vpop.permute.xlu1 %233  ;;  %v232_v44 = vpop.permute.xlu0 %231 }
  0x9e   : > { %v236_v46 = vsel %vm1154_vm11, %v232_v44, %v234_v43  ;;  %v237_v47 = vsel %vm1154_vm11, %v234_v43, %v232_v44 }
  0x9f   : > { %720 = vmatprep.subr.msk.mxu0 %vm936_vm6, %v236_v46 }
  0xa0   : > { %721 = vmatpush1.msk.msra.mxu0 %vm1025_vm13, %v237_v47 }
  0xa1   : > { %722 = vmatmul.mubr.msk.f32.vlgmr.msra.gmra.mxu0 %vm351_vm15, %v199_v48  ;;  %542 = vmatprep.subr.mxu0 %v879_v1 }
  0xa2   : > { %543 = vmatpush1.msra.mxu0 %v873_v0  ;;  %576 = vmatprep.mubr.f32.mxu0 %v826_v2 }
 0x161   : > { %v421_v49 = vpop.f32.mrf.mxu0 }
 0x162   : > { %vm428_vm12 = vcmp.lt.f32.partialorder %v421_v49, 0.0  ;;  %vm426_vm11 = vcmp.gt.f32.partialorder %v421_v49, 0.0 }
 0x163   : > { %v430_v50 = vsel %vm428_vm12, -1.0, %v826_v2  ;;  %v423_v51 = vpop.f32.mrf.mxu0 }
 0x164   : > { %vm427_vm10 = vcmp.gt.f32.partialorder %v423_v51, 0.0  ;;  %vm429_vm1 = vcmp.lt.f32.partialorder %v423_v51, 0.0  ;;  %v1046_v53 = vsel %vm426_vm11, 1.0, %v430_v50  ;;  %vm1174_vm11 = vcmp.lt.s32.totalorder %v910_v4, 127 }
 0x165   : > { %v431_v52 = vsel %vm429_vm1, -1.0, %v826_v2  ;;  %vm508_vm1 = vcmask 64512  }
 0x166   : > { %v1048_v54 = vsel %vm427_vm10, 1.0, %v431_v52  ;;  %723 = vmatmul.mubr.msk.f32.vlgmr.msra.gmra.mxu0 %vm508_vm1, %v201_v56  ;;  %vm586_vm10 = vcmask 1043456   ;;  %vm1175_vm1 = vmmov %vm1174_vm11 }
 0x167   : > { %v778_v55 = vpack.i.bf16 %v1048_v54, %v1046_v53 }
 0x169   : > { %779 = vrot.lane.b32.xlu1 %v778_v55, %s823_s23  ;;  %774 = vrot.lane.b32.xlu0 %v778_v55, %s822_s22 }
 0x16d   : > { %789 = vrot.lane.b32.xlu1 %v778_v55, %s824_s24  ;;  %784 = vrot.lane.b32.xlu0 %v778_v55, %s821_s21 }
 0x171   : > { %799 = vrot.lane.b32.xlu1 %v778_v55, %s825_s25  ;;  %794 = vrot.lane.b32.xlu0 %v778_v55, %s827_s26 }
 0x175   : > { %809 = vrot.lane.b32.xlu1 %v778_v55, %s828_s27  ;;  %804 = vrot.lane.b32.xlu0 %v778_v55, %s829_s28 }
 0x1db   : > { %v780_v58 = vpop.permute.xlu1 %779  ;;  %v775_v59 = vpop.permute.xlu0 %774 }
 0x1dc   : > { %v777_v60 = vunpack.i.h.bf16 %v775_v59  ;;  %v776_v61 = vunpack.i.l.bf16 %v775_v59  ;;  %v782_v62 = vunpack.i.h.bf16 %v780_v58  ;;  %v781_v63 = vunpack.i.l.bf16 %v780_v58 }
 0x1de   : > { %v495_v0 = vsel %vm340_vm2, %v777_v60, %v776_v61  ;;  %v494_v1 = vsel %vm340_vm2, %v776_v61, %v777_v60  ;;  %v479_v17 = vsel %vm310_vm7, %v782_v62, %v781_v63  ;;  %vm1173_vm2 = vcmp.lt.s32.totalorder %v913_v5, 240 }
 0x1df   : > { %v790_v3 = vpop.permute.xlu1 %789  ;;  %v785_v6 = vpop.permute.xlu0 %784  ;;  %v497_v7 = vsel %vm927_vm3, %v495_v0, 0.0  ;;  %v496_v8 = vsel %vm932_vm5, %v494_v1, 0.0  ;;  %vm725_vm3 = vmpackc.low %vm1173_vm2, %vm955_vm8  ;;  %v478_v32 = vsel %vm310_vm7, %v781_v63, %v782_v62  ;;  %vm1176_vm7 = vcmp.lt.s32.totalorder %v910_v4, 1 }
 0x1e0   : > { %v787_v10 = vunpack.i.h.bf16 %v785_v6  ;;  %v786_v12 = vunpack.i.l.bf16 %v785_v6  ;;  %v507_v13 = vpack.c.bf16 %v497_v7, %v497_v7  ;;  %v506_v16 = vpack.c.bf16 %v496_v8, %v496_v8 }
 0x1e1   : > { %v792_v18 = vunpack.i.h.bf16 %v790_v3  ;;  %v791_v20 = vunpack.i.l.bf16 %v790_v3 }
 0x1e2   : > { %v487_v21 = vsel %vm327_vm4, %v787_v10, %v786_v12  ;;  %724 = vmatprep.subr.msk.bf16.mxu1 %vm586_vm10, %v507_v13  ;;  %v486_v25 = vsel %vm327_vm4, %v786_v12, %v787_v10  ;;  %v588_v30 = vsel %vm586_vm10, %v506_v16, 0  ;;  %vm831_vm4 = vmmov 1  }
 0x1e3   : > { %v726_v22 = vpack.c.bf16 %v487_v21, %v479_v17  ;;  %v800_v11 = vpop.permute.xlu1 %799  ;;  %v795_v24 = vpop.permute.xlu0 %794  ;;  %v471_v31 = vsel %vm1174_vm11, %v792_v18, %v791_v20  ;;  %600 = vmatpush1.bf16.msra.mxu1 %v588_v30  ;;  %vm728_vm8 = vmpackc.low %vm831_vm4, %vm963_vm9  ;;  %v729_v5 = vpack.c.bf16 %v486_v25, %v478_v32  ;;  %v470_v19 = vsel %vm1175_vm1, %v791_v20, %v792_v18 }
 0x1e4   : > { %v802_v26 = vunpack.i.h.bf16 %v800_v11  ;;  %v801_v27 = vunpack.i.l.bf16 %v800_v11  ;;  %v797_v28 = vunpack.i.h.bf16 %v795_v24  ;;  %v796_v29 = vunpack.i.l.bf16 %v795_v24  ;;  %vm731_vm12 = vmpackc.low %vm916_vm0, %vm831_vm4 }
 0x1e5   : > { %727 = vmatprep.subr.msk.bf16.mxu1 %vm725_vm3, %v726_v22  ;;  %v732_v35 = vpack.c.bf16 %v471_v31, %v1048_v54  ;;  %vm1177_vm10 = vcmp.lt.s32.totalorder %v910_v4, 15  ;;  %vm734_vm2 = vmpackc.low %vm932_vm5, %vm831_vm4  ;;  %v735_v43 = vpack.c.bf16 %v470_v19, %v1046_v53 }
 0x1e6   : > { %v462_v37 = vsel %vm1176_vm7, %v801_v27, %v802_v26  ;;  %v454_v38 = vsel %vm1177_vm10, %v796_v29, %v797_v28  ;;  %vm737_vm3 = vmpackc.low %vm936_vm6, %vm916_vm0 }
 0x1e7   : > { %v810_v33 = vpop.permute.xlu1 %809  ;;  %v805_v34 = vpop.permute.xlu0 %804  ;;  %730 = vmatpush1.bf16.msk.msra.mxu1 %vm728_vm8, %v729_v5  ;;  %vm1178_vm11 = vmmov %vm1176_vm7  ;;  %v738_v47 = vpack.c.bf16 %v462_v37, %v454_v38  ;;  %vm1180_vm8 = vcmp.lt.s32.totalorder %v910_v4, 16 }
 0x1e8   : > { %v812_v39 = vunpack.i.h.bf16 %v810_v33  ;;  %v811_v40 = vunpack.i.l.bf16 %v810_v33  ;;  %v807_v41 = vunpack.i.h.bf16 %v805_v34  ;;  %v806_v42 = vunpack.i.l.bf16 %v805_v34  ;;  %733 = vmatprep.subr.msk.bf16.mxu1 %vm731_vm12, %v732_v35  ;;  %vm1179_vm1 = vmmov %vm1177_vm10 }
 0x1e9   : > { %v463_v44 = vsel %vm1178_vm11, %v802_v26, %v801_v27  ;;  %v455_v46 = vsel %vm1179_vm1, %v797_v28, %v796_v29  ;;  %vm1181_vm12 = vcmp.lt.s32.totalorder %v910_v4, 17  ;;  %vm740_vm0 = vmpackc.low %vm963_vm9, %vm1001_vm14 }
 0x1ea   : > { %v446_v48 = vsel %vm1180_vm8, %v811_v40, %v812_v39  ;;  %v438_v14 = vsel %vm1181_vm12, %v806_v42, %v807_v41  ;;  %v741_v9 = vpack.c.bf16 %v463_v44, %v455_v46  ;;  %vm743_vm5 = vmpackc.low %vm831_vm4, %vm936_vm6 }
 0x1eb   : > { %736 = vmatpush1.bf16.msk.msra.mxu1 %vm734_vm2, %v735_v43  ;;  %vm1182_vm7 = vmmov %vm1180_vm8  ;;  %v744_v51 = vpack.c.bf16 %v446_v48, %v438_v14  ;;  %vm1184_vm2 = vcmp.ge.s32.totalorder %v910_v4, 16 }
 0x1ec   : > { %739 = vmatprep.subr.msk.bf16.mxu1 %vm737_vm3, %v738_v47  ;;  %v447_v49 = vsel %vm1182_vm7, %v812_v39, %v811_v40  ;;  %vm1183_vm10 = vmmov %vm1181_vm12 }
 0x1ed   : > { %v439_v50 = vsel %vm1183_vm10, %v807_v41, %v806_v42  ;;  %vm746_vm9 = vmpackc.low %vm1184_vm2, %vm1025_vm13 }
 0x1ee   : > { %v747_v23 = vpack.c.bf16 %v447_v49, %v439_v50 }
 0x1ef   : > { %742 = vmatpush1.bf16.msk.msra.mxu1 %vm740_vm0, %v741_v9 }
 0x1f0   : > { %745 = vmatprep.subr.msk.bf16.mxu1 %vm743_vm5, %v744_v51 }
 0x1f3   : > { %748 = vmatpush1.bf16.msk.msra.mxu1 %vm746_vm9, %v747_v23 }
 0x1f6   : > { %749 = vmatmul.mubr.msk.bf16.vlgmr.msra.gmra.mxu1 %vm351_vm15, %v200_v15 }
 0x226   : > { %v578_v36 = vpop.f32.mrf.mxu0 }
 0x228   : > { %v580_v54 = vpop.f32.mrf.mxu0 }
 0x2b6   : > { %v627_v52 = vpop.f32.mrf.mxu1 }
 0x2b7   : > { %v628_v53 = vadd.f32 %v627_v52, %v578_v36 }
 0x2b8   : > { %v629_v55 = vpop.f32.mrf.mxu1 }
 0x2b9   : > { %vm634_vm6 = vcmp.gt.f32.partialorder %v628_v53, 0.0  ;;  %vm636_vm13 = vcmp.lt.f32.partialorder %v628_v53, 0.0  ;;  %v630_v4 = vadd.f32 %v629_v55, %v580_v54 }
 0x2ba   : > { %v638_v45 = vsel %vm636_vm13, -1.0, %v826_v2  ;;  %v631_v56 = vpop.f32.mrf.mxu1 }
 0x2bb   : > { %v640_v57 = vsel %vm634_vm6, 1.0, %v638_v45  ;;  %vm635_vm14 = vcmp.gt.f32.partialorder %v630_v4, 0.0  ;;  %vm637_vm4 = vcmp.lt.f32.partialorder %v630_v4, 0.0 }
 0x2bc   : > { %642 = vst [vmem:[%s197_s11] sm:$0xff] %v640_v57  ;;  %v639_v58 = vsel %vm637_vm4, -1.0, %v826_v2  ;;  %v632_v59 = vpop.f32.mrf.mxu1 }
 0x2bd   : > { %v641_v60 = vsel %vm635_vm14, 1.0, %v639_v58 }
 0x2be   : > { %643 = vst [vmem:[%s197_s11 + $0x8] sm:$0xff] %v641_v60 }
 0x2bf PF: > { %s14_s15 = sadd.s32 1, %s819_s15  }
 0x2c0   : > { %p11_p4 = scmp.ge.s32.totalorder %s14_s15, 4  }
 0x2c2   :  { %13 = sbr.rel (!%p11_p4) target bundleno = 1 (0x1), region = 66 }

</bundles_post_ra>
